<compile_context>
chip_gen: v6e
topology: v6e:2x2x1
jax: 0.10.0
libtpu: 0.0.40
codegen_flags: <defaults>
</compile_context>

<pallas_src>
import jax
import jax.numpy as jnp
from jax import lax
from jax.experimental import pallas as pl
from jax.experimental.pallas import tpu as pltpu

EPS = 1e-5

# Contract dim 1 of lhs with dim 1 of rhs ("NT" matmul: lhs @ rhs.T).
_NT = (((1,), (1,)), ((), ()))


# --------------------------------------------------------------------------
# Kernel: x tile (TB, 9) in natural layout -> out tile (1, TB).
# Batch lives on the lane axis for every activation (feature-major compute).
# --------------------------------------------------------------------------
def perceptron_kernel(x_ref, w1_ref, b1_ref, w2_ref, b2_ref, w3_ref, b3_ref,
                      o_ref):
    x = x_ref[...]                                                  # (TB, 9)

    # layer_1 + ReLU: h1^T = W1 @ x^T  (NT contraction, no explicit transpose)
    h = lax.dot_general(w1_ref[...], x, _NT,
                        preferred_element_type=jnp.float32)         # (32, TB)
    h = jnp.maximum(h + b1_ref[...], 0.0)

    # layer_2 + ReLU, BN1 pre-folded into (W2', b2')
    h = jnp.dot(w2_ref[...], h, preferred_element_type=jnp.float32)  # (32, TB)
    h = jnp.maximum(h + b2_ref[...], 0.0)

    # dropout(p=0.1) -> identity in eval mode
    # layer_out, BN2 pre-folded into (W3', b3') -> lane-dense (1, TB) store
    o_ref[...] = (jnp.dot(w3_ref[...], h, preferred_element_type=jnp.float32)
                  + b3_ref[...])


# --------------------------------------------------------------------------
# Parameter prep: fold inference-mode BatchNorm into the next Linear.
#   BN(h) = scale*h + shift,  scale = g*rsqrt(v+eps), shift = be - m*scale
#   W @ BN(h) + b = (W * scale[None, :]) @ h + (W @ shift + b)
# --------------------------------------------------------------------------
def _fold_bn_into_next_linear(w_next, b_next, gamma, beta, mean, var):
    scale = gamma * lax.rsqrt(var + EPS)
    shift = beta - mean * scale
    return w_next * scale[None, :], b_next + w_next @ shift


def prep_kernel_params(p):
    w2f, b2f = _fold_bn_into_next_linear(p["w2"], p["b2"],
                                         p["g1"], p["be1"], p["m1"], p["v1"])
    w3f, b3f = _fold_bn_into_next_linear(p["w3"], p["b3"],
                                         p["g2"], p["be2"], p["m2"], p["v2"])
    return (
        p["w1"].astype(jnp.float32), p["b1"].reshape(-1, 1).astype(jnp.float32),
        w2f.astype(jnp.float32),     b2f.reshape(-1, 1).astype(jnp.float32),
        w3f.astype(jnp.float32),     b3f.reshape(-1, 1).astype(jnp.float32),
    )


def _round_up(n, m):
    return ((n + m - 1) // m) * m


# --------------------------------------------------------------------------
# Wrapper: tile the batch, keep weights resident in VMEM.
#   block_b ~16K keeps (2 x-buffers @ 512 B/row + activations) around 22 MiB.
#   Raise vmem_limit_bytes together with block_b if you push tiles higher.
# --------------------------------------------------------------------------
def perceptron_forward(x, kernel_params, block_b=16384):
    w1, b1, w2, b2, w3, b3 = kernel_params
    B = x.shape[0]
    x = x.astype(jnp.float32)

    # Lane-align the batch (only copies when B % 128 != 0; production-sized,
    # 128-aligned batches are streamed with zero extra passes).
    B128 = _round_up(B, 128)
    if B128 != B:
        x = jnp.pad(x, ((0, B128 - B), (0, 0)))

    tb = max(128, min(_round_up(block_b, 128), B128))
    n_blocks = pl.cdiv(B128, tb)
    if n_blocks == 1 and B128 >= 256:
        # Give the v7x megacore (2 TensorCores) at least two grid steps.
        tb = _round_up(pl.cdiv(B128, 2), 128)
        n_blocks = pl.cdiv(B128, tb)
    B_out = n_blocks * tb        # trailing partial x-block reads are masked;
                                 # their (garbage) columns are sliced off below

    const = lambda i: (0, 0)     # weights: same block every step (VMEM-resident)

    n_weight_bytes = 4 * sum(int(a.size) for a in kernel_params)
    cost = pl.CostEstimate(
        flops=2 * B_out * (9 * 32 + 32 * 32 + 32),
        transcendentals=0,
        bytes_accessed=B128 * 9 * 4 + B_out * 4 + n_weight_bytes,
    )

    out = pl.pallas_call(
        perceptron_kernel,
        out_shape=jax.ShapeDtypeStruct((1, B_out), jnp.float32),
        grid=(n_blocks,),
        in_specs=[
            pl.BlockSpec((tb, 9), lambda i: (i, 0)),   # x tile, natural layout
            pl.BlockSpec(w1.shape, const),
            pl.BlockSpec(b1.shape, const),
            pl.BlockSpec(w2.shape, const),
            pl.BlockSpec(b2.shape, const),
            pl.BlockSpec(w3.shape, const),
            pl.BlockSpec(b3.shape, const),
        ],
        out_specs=pl.BlockSpec((1, tb), lambda i: (0, i)),
        compiler_params=pltpu.CompilerParams(
            dimension_semantics=("parallel",),
            vmem_limit_bytes=40 * 1024 * 1024,
        ),
        cost_estimate=cost,
    )(x, w1, b1, w2, b2, w3, b3)

    return out[0, :B].reshape(B, 1)     # matches nn.Linear output layout


def make_perceptron_fn(params, block_b=16384):
    """Fold BN into the Linears once; return a jitted forward function."""
    kernel_params = tuple(jnp.asarray(a) for a in prep_kernel_params(params))

    @jax.jit
    def fwd(x):
        return perceptron_forward(x, kernel_params, block_b=block_b)

    return fwd


# --------------------------------------------------------------------------
# Deterministic synthetic parameters (PyTorch conventions: W is (out, in)).
# Non-trivial BN running stats so the folding path is actually exercised.
# --------------------------------------------------------------------------
def init_params(key):
    ks = jax.random.split(key, 14)

    def lin(kw, kb, fan_in, fan_out):
        bound = 1.0 / jnp.sqrt(jnp.float32(fan_in))
        w = jax.random.uniform(kw, (fan_out, fan_in), jnp.float32, -bound, bound)
        b = jax.random.uniform(kb, (fan_out,), jnp.float32, -bound, bound)
        return w, b

    w1, b1 = lin(ks[0], ks[1], 9, 32)
    w2, b2 = lin(ks[2], ks[3], 32, 32)
    w3, b3 = lin(ks[4], ks[5], 32, 1)

    def bn(kg, kb, km, kv, n):
        g = jax.random.uniform(kg, (n,), jnp.float32, 0.5, 1.5)
        be = 0.1 * jax.random.normal(kb, (n,), jnp.float32)
        m = 0.1 * jax.random.normal(km, (n,), jnp.float32)
        v = jax.random.uniform(kv, (n,), jnp.float32, 0.5, 1.5)
        return g, be, m, v

    g1, be1, m1, v1 = bn(ks[6], ks[7], ks[8], ks[9], 32)
    g2, be2, m2, v2 = bn(ks[10], ks[11], ks[12], ks[13], 32)

    return dict(
        w1=w1, b1=b1, g1=g1, be1=be1, m1=m1, v1=v1,
        w2=w2, b2=b2, g2=g2, be2=be2, m2=m2, v2=v2,
        w3=w3, b3=b3,
    )


# Pure-JAX reference in the original (unfolded, batch-major) form.
def reference_forward(x, p):
    h = jnp.maximum(x @ p["w1"].T + p["b1"], 0.0)
    h = (h - p["m1"]) * lax.rsqrt(p["v1"] + EPS) * p["g1"] + p["be1"]
    h = jnp.maximum(h @ p["w2"].T + p["b2"], 0.0)
    h = (h - p["m2"]) * lax.rsqrt(p["v2"] + EPS) * p["g2"] + p["be2"]
    return h @ p["w3"].T + p["b3"]


if __name__ == "__main__":
    key = jax.random.PRNGKey(0)
    k_x, k_p = jax.random.split(key)

    B = 200                       # small batch; exercises padding + 2 grid steps
    x = jax.random.normal(k_x, (B, 9), jnp.float32)
    params = init_params(k_p)

    fwd = make_perceptron_fn(params, block_b=16384)
    out = jax.block_until_ready(fwd(x))

    ref = reference_forward(x, params)
    assert out.shape == (B, 1), out.shape
    assert jnp.allclose(out, ref, atol=1e-4, rtol=1e-4), "mismatch vs reference"

    print("KERNEL_OK")
</pallas_src>

<mosaic_0001>
module attributes {stable_mosaic.version = 11 : i64} {
  func.func @perceptron_kernel(%arg0: i32, %arg1: memref<128x9xf32, #tpu.memory_space<vmem>>, %arg2: memref<32x9xf32, #tpu.memory_space<vmem>>, %arg3: memref<32x1xf32, #tpu.memory_space<vmem>>, %arg4: memref<32x32xf32, #tpu.memory_space<vmem>>, %arg5: memref<32x1xf32, #tpu.memory_space<vmem>>, %arg6: memref<1x32xf32, #tpu.memory_space<vmem>>, %arg7: memref<1x1xf32, #tpu.memory_space<vmem>>, %arg8: memref<1x128xf32, #tpu.memory_space<vmem>>) attributes {dimension_semantics = [#tpu.dimension_semantics<parallel>], iteration_bounds = array<i64: 2>, scalar_prefetch = 0 : i64, scratch_operands = 0 : i64, tpu.core_type = #tpu.core_type<tc>, window_params = [{transform_indices = @transform_0, window_bounds = array<i64: 128, 9>}, {pipeline_mode = #tpu.pipeline_mode<synchronous>, transform_indices = @transform_1, window_bounds = array<i64: 32, 9>}, {pipeline_mode = #tpu.pipeline_mode<synchronous>, transform_indices = @transform_2, window_bounds = array<i64: 32, 1>}, {pipeline_mode = #tpu.pipeline_mode<synchronous>, transform_indices = @transform_3, window_bounds = array<i64: 32, 32>}, {pipeline_mode = #tpu.pipeline_mode<synchronous>, transform_indices = @transform_4, window_bounds = array<i64: 32, 1>}, {pipeline_mode = #tpu.pipeline_mode<synchronous>, transform_indices = @transform_5, window_bounds = array<i64: 1, 32>}, {pipeline_mode = #tpu.pipeline_mode<synchronous>, transform_indices = @transform_6, window_bounds = array<i64: 1, 1>}, {transform_indices = @transform_7, window_bounds = array<i64: 1, 128>}]} {
    %c0 = arith.constant 0 : index
    %c0_0 = arith.constant 0 : index
    %0 = vector.load %arg1[%c0, %c0_0] : memref<128x9xf32, #tpu.memory_space<vmem>>, vector<128x9xf32>
    %c0_1 = arith.constant 0 : index
    %c0_2 = arith.constant 0 : index
    %1 = vector.load %arg2[%c0_1, %c0_2] : memref<32x9xf32, #tpu.memory_space<vmem>>, vector<32x9xf32>
    %cst = arith.constant dense<0.000000e+00> : vector<32x128xf32>
    %2 = tpu.matmul %1, %0, %cst {dimension_numbers = #tpu.dot_dimension_numbers<[1], [1], [0], [0], [0, 0, 1, 0], [], []>} : vector<32x9xf32>, vector<128x9xf32>, vector<32x128xf32> -> vector<32x128xf32>
    %c0_3 = arith.constant 0 : index
    %c0_4 = arith.constant 0 : index
    %3 = vector.load %arg3[%c0_3, %c0_4] : memref<32x1xf32, #tpu.memory_space<vmem>>, vector<32x1xf32>
    %4 = vector.broadcast %3 : vector<32x1xf32> to vector<32x128xf32>
    %5 = arith.addf %2, %4 : vector<32x128xf32>
    %cst_5 = arith.constant 0.000000e+00 : f32
    %6 = vector.broadcast %cst_5 : f32 to vector<32x128xf32>
    %7 = arith.maximumf %5, %6 : vector<32x128xf32>
    %c0_6 = arith.constant 0 : index
    %c0_7 = arith.constant 0 : index
    %8 = vector.load %arg4[%c0_6, %c0_7] : memref<32x32xf32, #tpu.memory_space<vmem>>, vector<32x32xf32>
    %cst_8 = arith.constant dense<0.000000e+00> : vector<32x128xf32>
    %9 = tpu.matmul %8, %7, %cst_8 {dimension_numbers = #tpu.dot_dimension_numbers<[1], [0], [0], [1], [0, 0, 1, 1], [], []>} : vector<32x32xf32>, vector<32x128xf32>, vector<32x128xf32> -> vector<32x128xf32>
    %c0_9 = arith.constant 0 : index
    %c0_10 = arith.constant 0 : index
    %10 = vector.load %arg5[%c0_9, %c0_10] : memref<32x1xf32, #tpu.memory_space<vmem>>, vector<32x1xf32>
    %11 = vector.broadcast %10 : vector<32x1xf32> to vector<32x128xf32>
    %12 = arith.addf %9, %11 : vector<32x128xf32>
    %cst_11 = arith.constant 0.000000e+00 : f32
    %13 = vector.broadcast %cst_11 : f32 to vector<32x128xf32>
    %14 = arith.maximumf %12, %13 : vector<32x128xf32>
    %c0_12 = arith.constant 0 : index
    %c0_13 = arith.constant 0 : index
    %15 = vector.load %arg6[%c0_12, %c0_13] : memref<1x32xf32, #tpu.memory_space<vmem>>, vector<1x32xf32>
    %cst_14 = arith.constant dense<0.000000e+00> : vector<1x128xf32>
    %16 = tpu.matmul %15, %14, %cst_14 {dimension_numbers = #tpu.dot_dimension_numbers<[1], [0], [0], [1], [0, 0, 1, 1], [], []>} : vector<1x32xf32>, vector<32x128xf32>, vector<1x128xf32> -> vector<1x128xf32>
    %c0_15 = arith.constant 0 : index
    %c0_16 = arith.constant 0 : index
    %17 = vector.load %arg7[%c0_15, %c0_16] : memref<1x1xf32, #tpu.memory_space<vmem>>, vector<1x1xf32>
    %18 = vector.broadcast %17 : vector<1x1xf32> to vector<1x128xf32>
    %19 = arith.addf %16, %18 : vector<1x128xf32>
    %c0_17 = arith.constant 0 : index
    %c0_18 = arith.constant 0 : index
    %20 = vector.load %arg8[%c0_17, %c0_18] : memref<1x128xf32, #tpu.memory_space<vmem>>, vector<1x128xf32>
    tpu.vector_store %arg8[%c0_17, %c0_18], %19 {strides = array<i32>} : memref<1x128xf32, #tpu.memory_space<vmem>>, vector<1x128xf32>,
    return
  }
  func.func @transform_0(%arg0: i32) -> (i32, i32) {
    %c0_i32 = arith.constant 0 : i32
    %c0_i32_0 = arith.constant 0 : i32
    return %arg0, %c0_i32 : i32, i32
  }
  func.func @transform_1(%arg0: i32) -> (i32, i32) {
    %c0_i32 = arith.constant 0 : i32
    %c0_i32_0 = arith.constant 0 : i32
    %c0_i32_1 = arith.constant 0 : i32
    return %c0_i32, %c0_i32_0 : i32, i32
  }
  func.func @transform_2(%arg0: i32) -> (i32, i32) {
    %c0_i32 = arith.constant 0 : i32
    %c0_i32_0 = arith.constant 0 : i32
    %c0_i32_1 = arith.constant 0 : i32
    return %c0_i32, %c0_i32_0 : i32, i32
  }
  func.func @transform_3(%arg0: i32) -> (i32, i32) {
    %c0_i32 = arith.constant 0 : i32
    %c0_i32_0 = arith.constant 0 : i32
    %c0_i32_1 = arith.constant 0 : i32
    return %c0_i32, %c0_i32_0 : i32, i32
  }
  func.func @transform_4(%arg0: i32) -> (i32, i32) {
    %c0_i32 = arith.constant 0 : i32
    %c0_i32_0 = arith.constant 0 : i32
    %c0_i32_1 = arith.constant 0 : i32
    return %c0_i32, %c0_i32_0 : i32, i32
  }
  func.func @transform_5(%arg0: i32) -> (i32, i32) {
    %c0_i32 = arith.constant 0 : i32
    %c0_i32_0 = arith.constant 0 : i32
    %c0_i32_1 = arith.constant 0 : i32
    return %c0_i32, %c0_i32_0 : i32, i32
  }
  func.func @transform_6(%arg0: i32) -> (i32, i32) {
    %c0_i32 = arith.constant 0 : i32
    %c0_i32_0 = arith.constant 0 : i32
    %c0_i32_1 = arith.constant 0 : i32
    return %c0_i32, %c0_i32_0 : i32, i32
  }
  func.func @transform_7(%arg0: i32) -> (i32, i32) {
    %c0_i32 = arith.constant 0 : i32
    %c0_i32_0 = arith.constant 0 : i32
    return %c0_i32, %arg0 : i32, i32
  }
}

</mosaic_0001>

<bundles_post_ra>
// kernel: fwd.1
= control target key start
LH: loop header
LB: loop body
LE: loop exit
PB: predicated region body
PF: predicated region fallthrough
CT: control target
= control target key end

     0   :  { %s932_s26 = smov 0   ;;  %s1064_s0 = inlined_call_operand.vmem [shape: f32[256,9], index: 0, kind: input, shape index: {}]   ;;  %s1065_s1 = inlined_call_operand.vmem [shape: f32[32,9], index: 1, kind: input, shape index: {}]   ;;  %s1066_s2 = inlined_call_operand.vmem [shape: f32[32,1], index: 2, kind: input, shape index: {}]   ;;  %s1067_s3 = inlined_call_operand.vmem [shape: f32[32,32], index: 3, kind: input, shape index: {}]   ;;  %s1068_s4 = inlined_call_operand.vmem [shape: f32[32,1], index: 4, kind: input, shape index: {}]   ;;  %s1069_s5 = inlined_call_operand.vmem [shape: f32[1,32], index: 5, kind: input, shape index: {}]   ;;  %s1070_s6 = inlined_call_operand.<no memory space> [shape: f32[1,1], index: 6, kind: input, shape index: {}]   ;;  %s1071_s7 = inlined_call_operand.vmem [shape: f32[1,256], index: 7, kind: output, shape index: {}]  }
   0x1   :  { %v12_v0 = vstv %s1070_s6 }
   0x2   :  { %13 = vst [vmem:[#allocation2] sm:$0x1] %v12_v0 }
   0x3 LB: > { %s938_s27 = sadd.s32 4294967295, %s884_s26   ;;  %p739_p0 = scmp.ge.s32.totalorder %s884_s26, 1  ;;  %s884_s26 = sphi %s932_s26, %s19_s26  }
   0x4   : > { %p240_p1 = scmp.lt.s32.totalorder %s884_s26, 3 }
   0x6   : > { %p241_p2 = pnand %p739_p0, %p240_p1 }
   0x7   : > { %s740_s28 = sshll.u32 (!%p241_p2), %s938_s27, 4  ;;  %p276_p4 = scmp.lt.s32.totalorder (!%p241_p2), %s938_s27, 1 }
   0x8   : > { %244 = sbr.rel (%p241_p2) target bundleno = 694 (0x2b6), region = 48  ;;  %p271_p3 = scmp.lt.s32.totalorder (!%p241_p2), %s740_s28, 31 }
   0xd   : > { %vm323_vm0 = vcmask 72704   ;;  %v295_v1 = vld [vmem:[%s1065_s1] sm:$0xff]  ;;  %v886_v2 = vmov 0   ;;  %v302_v3 = vld [vmem:[%s1066_s2 + $0x18] sm:$0xff]  ;;  %v300_v4 = vld [vmem:[%s1066_s2 + $0x8] sm:$0xff]  ;;  %s1073_s28 = smov (!%p271_p3, %s740_s28), 31 }
   0xe   : > { %834 = vmatprep.mubr.msk.f32.mxu0 %vm323_vm0, %v295_v1  ;;  %876 = vset.pattern.permute.xlu0 %v886_v2  ;;  %v301_v5 = vld [vmem:[%s1066_s2 + $0x10] sm:$0xff]  ;;  %v299_v6 = vld [vmem:[%s1066_s2] sm:$0xff]  ;;  %s741_s15 = sshll.u32 %s1073_s28, 3  ;;  %v480_v9 = vld [vmem:[%s1068_s4 + $0x18] sm:$0xff]  ;;  %vm501_vm1 = vcmask 261120   ;;  %v887_v51 = vmov 0.0  }
   0xf   : > { %320 = vperm.xlu0 %876, %v302_v3   ;;  %877 = vset.pattern.permute.xlu1 %v886_v2  ;;  %s962_s18 = scalar_lea.vmem %s1064_s0, %s741_s15  ;;  %v479_v10 = vld [vmem:[%s1068_s4 + $0x10] sm:$0xff]  ;;  %v478_v12 = vld [vmem:[%s1068_s4 + $0x8] sm:$0xff]  ;;  %v477_v13 = vld [vmem:[%s1068_s4] sm:$0xff]  ;;  %vm888_vm2 = vmmov 0   ;;  %s1075_s27 = smov (!%p276_p4, %s938_s27), 1 }
  0x10   : > { %310 = vperm.xlu1 %877, %v300_v4   ;;  %v294_v7 = vld [vmem:[%s962_s18 + $0x78] sm:$0xff]  ;;  %v293_v8 = vld [vmem:[%s962_s18 + $0x70] sm:$0xff]  ;;  %v292_v11 = vld [vmem:[%s962_s18 + $0x68] sm:$0xff]  ;;  %s278_s23 = scalar_lea.vmem %s1071_s7, %s1075_s27 }
  0x11   : > { %802 = vmatprep.subr.msk.mxu0 %vm323_vm0, %v294_v7  ;;  %v291_v14 = vld [vmem:[%s962_s18 + $0x60] sm:$0xff]  ;;  %v290_v16 = vld [vmem:[%s962_s18 + $0x58] sm:$0xff]  ;;  %v289_v17 = vld [vmem:[%s962_s18 + $0x50] sm:$0xff] }
  0x12   : > { %803 = vmatpush3.xpose.msk.msra.mxu0 %vm323_vm0, %v294_v7  ;;  %v604_v15 = vld [vmem:[#allocation2] sm:$0x1]  ;;  %v288_v18 = vld [vmem:[%s962_s18 + $0x48] sm:$0xff]  ;;  %v286_v20 = vld [vmem:[%s962_s18 + $0x38] sm:$0xff] }
  0x13   : > { %315 = vperm.xlu0 %876, %v301_v5   ;;  %804 = vmatprep.subr.msk.mxu0 %vm323_vm0, %v293_v8  ;;  %v287_v19 = vld [vmem:[%s962_s18 + $0x40] sm:$0xff]  ;;  %v285_v21 = vld [vmem:[%s962_s18 + $0x30] sm:$0xff]  ;;  %v284_v22 = vld [vmem:[%s962_s18 + $0x28] sm:$0xff]  ;;  %v610_v5 = vlaneseq }
  0x14   : > { %305 = vperm.xlu1 %877, %v299_v6   ;;  %v283_v23 = vld [vmem:[%s962_s18 + $0x20] sm:$0xff]  ;;  %v282_v24 = vld [vmem:[%s962_s18 + $0x18] sm:$0xff]  ;;  %v281_v25 = vld [vmem:[%s962_s18 + $0x10] sm:$0xff] }
  0x15   : > { %v280_v26 = vld [vmem:[%s962_s18 + $0x8] sm:$0xff]  ;;  %v279_v27 = vld [vmem:[%s962_s18] sm:$0xff]  ;;  %v297_v29 = vld [vmem:[%s1065_s1 + $0x10] sm:$0xff]  ;;  %v611_v6 = vshrl.u32 %v610_v5, 7 }
  0x16   : > { %805 = vmatpush3.xpose.msk.msra.mxu0 %vm323_vm0, %v293_v8  ;;  %v296_v28 = vld [vmem:[%s1065_s1 + $0x8] sm:$0xff]  ;;  %v298_v30 = vld [vmem:[%s1065_s1 + $0x18] sm:$0xff]  ;;  %v473_v31 = vld [vmem:[%s1067_s3] sm:$0xff] }
  0x17   : > { %498 = vperm.xlu0 %876, %v480_v9   ;;  %806 = vmatprep.subr.msk.mxu0 %vm323_vm0, %v292_v11  ;;  %v474_v48 = vld [vmem:[%s1067_s3 + $0x8] sm:$0xff]  ;;  %v475_v49 = vld [vmem:[%s1067_s3 + $0x10] sm:$0xff]  ;;  %v476_v50 = vld [vmem:[%s1067_s3 + $0x18] sm:$0xff]  ;;  %v612_v7 = vsub.s32 0, %v611_v6 }
  0x18   : > { %493 = vperm.xlu1 %877, %v479_v10   ;;  %848 = vmatprep.mubr.msk.f32.mxu1 %vm501_vm1, %v473_v31  ;;  %v603_v4 = vld [vmem:[%s1069_s5] sm:$0x1] }
  0x1a   : > { %807 = vmatpush3.xpose.msk.msra.mxu0 %vm323_vm0, %v292_v11 }
  0x1b   : > { %488 = vperm.xlu0 %876, %v478_v12   ;;  %808 = vmatprep.subr.msk.mxu0 %vm323_vm0, %v291_v14 }
  0x1c   : > { %483 = vperm.xlu1 %877, %v477_v13  }
  0x1e   : > { %809 = vmatpush3.xpose.msk.msra.mxu0 %vm323_vm0, %v291_v14 }
  0x1f   : > { %607 = vperm.xlu0 %876, %v604_v15   ;;  %810 = vmatprep.subr.msk.mxu0 %vm323_vm0, %v290_v16 }
  0x22   : > { %811 = vmatpush3.xpose.msk.msra.mxu0 %vm323_vm0, %v290_v16 }
  0x23   : > { %812 = vmatprep.subr.msk.mxu0 %vm323_vm0, %v289_v17 }
  0x26   : > { %813 = vmatpush3.xpose.msk.msra.mxu0 %vm323_vm0, %v289_v17 }
  0x27   : > { %814 = vmatprep.subr.msk.mxu0 %vm323_vm0, %v288_v18 }
  0x2a   : > { %815 = vmatpush3.xpose.msk.msra.mxu0 %vm323_vm0, %v288_v18 }
  0x2b   : > { %816 = vmatprep.subr.msk.mxu0 %vm323_vm0, %v287_v19 }
  0x2e   : > { %817 = vmatpush3.xpose.msk.msra.mxu0 %vm323_vm0, %v287_v19 }
  0x2f   : > { %818 = vmatprep.subr.msk.mxu0 %vm323_vm0, %v286_v20 }
  0x32   : > { %819 = vmatpush3.xpose.msk.msra.mxu0 %vm323_vm0, %v286_v20 }
  0x33   : > { %820 = vmatprep.subr.msk.mxu0 %vm323_vm0, %v285_v21 }
  0x36   : > { %821 = vmatpush3.xpose.msk.msra.mxu0 %vm323_vm0, %v285_v21 }
  0x37   : > { %822 = vmatprep.subr.msk.mxu0 %vm323_vm0, %v284_v22 }
  0x3a   : > { %823 = vmatpush3.xpose.msk.msra.mxu0 %vm323_vm0, %v284_v22 }
  0x3b   : > { %824 = vmatprep.subr.msk.mxu0 %vm323_vm0, %v283_v23 }
  0x3e   : > { %825 = vmatpush3.xpose.msk.msra.mxu0 %vm323_vm0, %v283_v23 }
  0x3f   : > { %826 = vmatprep.subr.msk.mxu0 %vm323_vm0, %v282_v24 }
  0x42   : > { %827 = vmatpush3.xpose.msk.msra.mxu0 %vm323_vm0, %v282_v24 }
  0x43   : > { %828 = vmatprep.subr.msk.mxu0 %vm323_vm0, %v281_v25 }
  0x46   : > { %829 = vmatpush3.xpose.msk.msra.mxu0 %vm323_vm0, %v281_v25 }
  0x47   : > { %830 = vmatprep.subr.msk.mxu0 %vm323_vm0, %v280_v26 }
  0x4a   : > { %831 = vmatpush3.xpose.msk.msra.mxu0 %vm323_vm0, %v280_v26 }
  0x4b   : > { %832 = vmatprep.subr.msk.mxu0 %vm323_vm0, %v279_v27 }
  0x4e   : > { %833 = vmatpush3.xpose.msk.msra.mxu0 %vm323_vm0, %v279_v27 }
  0x51   : > { %835 = vmatmul.mubr.msk.f32.vlgmr.msra.gmra.mxu0 %vm323_vm0, %v296_v28 }
  0x52   : > { %837 = vmatprep.mubr.msk.f32.mxu0 %vm323_vm0, %v297_v29 }
  0x55   : > { %838 = vmatmul.mubr.msk.f32.gmra.mxu0 %vm323_vm0, %v298_v30 }
  0x8a   : > { %v321_v32 = vpop.permute.xlu0 %320 }
  0x8b   : > { %v311_v34 = vpop.permute.xlu1 %310 }
  0x8e   : > { %v316_v38 = vpop.permute.xlu0 %315 }
  0x8f   : > { %v306_v43 = vpop.permute.xlu1 %305 }
  0x92   : > { %v499_v52 = vpop.permute.xlu0 %498 }
  0x93   : > { %v494_v54 = vpop.permute.xlu1 %493 }
  0x96   : > { %v489_v58 = vpop.permute.xlu0 %488 }
  0x97   : > { %v484_v63 = vpop.permute.xlu1 %483 }
  0x9a   : > { %v608_v8 = vpop.permute.xlu0 %607 }
  0x9b   : > { %v613_v9 = vrot.slane %v608_v8, %v612_v7 }
 0x111   : > { %v836_v33 = vpop.f32.mrf.mxu0 }
 0x112   : > { %v456_v40 = vadd.f32 %v836_v33, %v311_v34 }
 0x113   : > { %v450_v35 = vpop.f32.mrf.mxu0 }
 0x114   : > { %v451_v44 = vadd.f32 %v450_v35, %v306_v43  ;;  %v470_v46 = vmax.f32 %v456_v40, 0.0 }
 0x115   : > { %v839_v36 = vpop.f32.mrf.mxu0 }
 0x116   : > { %v466_v37 = vadd.f32 %v839_v36, %v321_v32  ;;  %v469_v47 = vmax.f32 %v451_v44, 0.0 }
 0x117   : > { %v460_v39 = vpop.f32.mrf.mxu0 }
 0x118   : > { %v472_v41 = vmax.f32 %v466_v37, 0.0  ;;  %v461_v42 = vadd.f32 %v460_v39, %v316_v38 }
 0x11a   : > { %v471_v45 = vmax.f32 %v461_v42, 0.0  ;;  %840 = vmatprep.subr.mxu1 %v472_v41 }
 0x11b   : > { %841 = vmatpush3.msra.mxu1 %v472_v41 }
 0x11c   : > { %842 = vmatprep.subr.mxu1 %v471_v45 }
 0x11d   : > { %843 = vmatpush3.msra.mxu1 %v471_v45 }
 0x11e   : > { %844 = vmatprep.subr.mxu1 %v470_v46 }
 0x11f   : > { %845 = vmatpush3.msra.mxu1 %v470_v46 }
 0x120   : > { %846 = vmatprep.subr.mxu1 %v469_v47 }
 0x121   : > { %847 = vmatpush3.msra.mxu1 %v469_v47 }
 0x122   : > { %849 = vmatmul.mubr.msk.f32.vlgmr.msra.gmra.mxu1 %vm501_vm1, %v474_v48  ;;  %854 = vmatprep.subr.mxu1 %v887_v51 }
 0x123   : > { %851 = vmatprep.mubr.msk.f32.mxu1 %vm501_vm1, %v475_v49 }
 0x126   : > { %852 = vmatmul.mubr.msk.f32.gmra.mxu1 %vm501_vm1, %v476_v50 }
 0x127   : > { %862 = vmatprep.mubr.msk.f32.mxu1 %vm888_vm2, %v887_v51 }
 0x1e2   : > { %v850_v53 = vpop.f32.mrf.mxu1 }
 0x1e3   : > { %v586_v60 = vadd.f32 %v850_v53, %v489_v58 }
 0x1e4   : > { %v580_v55 = vpop.f32.mrf.mxu1 }
 0x1e5   : > { %v581_v0 = vadd.f32 %v580_v55, %v484_v63  ;;  %v600_v2 = vmax.f32 %v586_v60, 0.0 }
 0x1e6   : > { %v853_v56 = vpop.f32.mrf.mxu1 }
 0x1e7   : > { %v596_v57 = vadd.f32 %v853_v56, %v499_v52  ;;  %v599_v3 = vmax.f32 %v581_v0, 0.0 }
 0x1e8   : > { %v590_v59 = vpop.f32.mrf.mxu1 }
 0x1e9   : > { %v602_v61 = vmax.f32 %v596_v57, 0.0  ;;  %v591_v62 = vadd.f32 %v590_v59, %v494_v54 }
 0x1eb   : > { %v601_v1 = vmax.f32 %v591_v62, 0.0  ;;  %855 = vmatpush3.msra.mxu1 %v602_v61 }
 0x1ec   : > { %856 = vmatprep.subr.mxu1 %v887_v51 }
 0x1ed   : > { %857 = vmatpush3.msra.mxu1 %v601_v1 }
 0x1ee   : > { %858 = vmatprep.subr.mxu1 %v887_v51 }
 0x1ef   : > { %859 = vmatpush3.msra.mxu1 %v600_v2 }
 0x1f0   : > { %860 = vmatprep.subr.mxu1 %v887_v51 }
 0x1f1   : > { %861 = vmatpush3.msra.mxu1 %v599_v3 }
 0x1f2   : > { %863 = vmatmul.mubr.msk.f32.vlgmr.msra.gmra.mxu1 %vm501_vm1, %v603_v4 }
 0x2b2   : > { %v683_v10 = vpop.f32.mrf.mxu1 }
 0x2b3   : > { %v684_v11 = vadd.f32 %v683_v10, %v613_v9 }
 0x2b4   : > { %v864_v12 = vpop.f32.mrf.mxu1 }
 0x2b5   : > { %687 = vst [vmem:[%s278_s23] sm:$0x1] %v684_v11 }
 0x2b6 PF: > { %s19_s26 = sadd.s32 1, %s884_s26  }
 0x2b7   : > { %p16_p5 = scmp.ge.s32.totalorder %s19_s26, 4  }
 0x2b9   :  { %18 = sbr.rel (!%p16_p5) target bundleno = 3 (0x3), region = 78 }

</bundles_post_ra>
